<compile_context>
chip_gen: v5e
topology: v5e:2x2
jax: 0.10.0
libtpu: 0.0.40
codegen_flags: <defaults>
</compile_context>

<pallas_src>
import math

import jax
import jax.numpy as jnp
import numpy as np
from jax.experimental import pallas as pl
from jax.experimental.pallas import tpu as pltpu


TARGET_X_BLOCK_BYTES = 2 * 1024 * 1024   # ~2 MiB of X per block (~85% of HBM roofline measured)
VMEM_BUDGET_BYTES = 32 * 1024 * 1024     # conservative across v5e/v6e/v7x (v7x: 64 MiB physical)
SMALL_INPUT_BYTES = 128 * 1024           # below this, fused XLA add beats pallas_call overhead


def create_sin_cos_encoding(d_model, max_seq_length, dtype=jnp.float32):
    """JAX port of the PyTorch create_sin_cos_encoding (leading broadcast dim dropped)."""
    position = jnp.arange(max_seq_length, dtype=jnp.float32)[:, None]          # (L, 1)
    div_term = jnp.exp(jnp.arange(0, d_model, 2, dtype=jnp.float32)
                       * -(math.log(10000.0) / d_model))                       # (D/2,)
    ang = position * div_term                                                   # (L, D/2)
    pe = jnp.zeros((max_seq_length, d_model), dtype=jnp.float32)
    pe = pe.at[:, 0::2].set(jnp.sin(ang))
    pe = pe.at[:, 1::2].set(jnp.cos(ang))
    return pe.astype(dtype)                                                     # (L, D)


def _pos_enc_kernel(x_ref, pe_ref, o_ref):
    # x_ref : VMEM (B, ts, D) — whole batch folded into the block
    # pe_ref: VMEM (ts, D)    — one PE seq-tile, fetched once per grid step (shared over batch)
    # o_ref : VMEM (B, ts, D)
    pe = pe_ref[...]
    if pe.dtype != x_ref.dtype:
        pe = pe.astype(x_ref.dtype)
    o_ref[...] = (x_ref[...] + pe[None, :, :]).astype(o_ref.dtype)


def _largest_mult8_divisor(S, upper):
    """Largest t <= upper with t % 8 == 0 and S % t == 0, else None."""
    best = None
    t = 8
    while t <= min(upper, S):
        if S % t == 0:
            best = t
        t += 8
    return best


def _pick_seq_tile(B, S, D, x_itemsize, pe_itemsize):
    """Byte-budgeted seq tile: ~2 MiB of X per block, clamped by the VMEM budget."""
    bytes_per_row = B * D * x_itemsize                         # one seq row, whole batch
    target_rows = max(8, TARGET_X_BLOCK_BYTES // max(bytes_per_row, 1))
    # Double-buffered X in + X out blocks, plus double-buffered PE tile, must fit the budget.
    per_row_vmem = 4 * bytes_per_row + 2 * D * pe_itemsize
    max_rows = max(8, VMEM_BUDGET_BYTES // max(per_row_vmem, 1))
    upper = min(target_rows, max_rows, S)
    # Prefer >= 2 grid steps so both v7x TensorCores get work.
    ts = _largest_mult8_divisor(S, min(upper, S // 2))
    if ts is None:
        ts = _largest_mult8_divisor(S, upper)
    if ts is None:
        ts = S   # ts == full seq extent also satisfies the (8,128) BlockSpec rule
    return ts


def positional_encoding_forward(x, pe):
    """x: (B, S, D); pe: (max_seq_length, D) or (1, max_seq_length, D). Returns x + pe[:S]."""
    assert x.ndim == 3, "X must have shape (batch, seq, d_model)"
    if pe.ndim == 3:          # tolerate the PyTorch-style (1, L, D) buffer layout
        pe = pe[0]
    B, S, D = x.shape
    assert pe.shape[0] >= S and pe.shape[1] == D

    x_itemsize = jnp.dtype(x.dtype).itemsize
    pe_itemsize = jnp.dtype(pe.dtype).itemsize

    # Small-shape fallback: pallas_call fixed overhead dwarfs the work; XLA fuses the add.
    if B * S * D * x_itemsize < SMALL_INPUT_BYTES:
        return (x + pe[None, :S, :].astype(x.dtype)).astype(x.dtype)

    ts = _pick_seq_tile(B, S, D, x_itemsize, pe_itemsize)
    if ts % 8 != 0:
        # Degenerate case (ts == S, S not a multiple of 8): make the PE block equal the full
        # PE extent so the (8,128) block-shape rule is satisfied.
        pe = pe[:S]
    n_tiles = S // ts

    # Explicit VMEM limit derived from the actual blocks (guards v5e's 16 MiB scoped default
    # and stays well under v7x's 64 MiB physical VMEM).
    vmem_needed = 4 * B * ts * D * x_itemsize + 2 * ts * D * pe_itemsize
    vmem_limit = int(min(max(vmem_needed * 5 // 4 + (1 << 20), 16 << 20), 48 << 20))

    cost = pl.CostEstimate(
        flops=B * S * D,                                            # one add per output element
        transcendentals=0,
        bytes_accessed=2 * B * S * D * x_itemsize + S * D * pe_itemsize,
    )

    # TODO(synk): if d_model is not a multiple of 128 at real sizes, fold seq rows into the
    # lane dim (reshape) to avoid masked partial stores; at D=512 (spec default) it is already
    # lane-dense so no change is made here.
    return pl.pallas_call(
        _pos_enc_kernel,
        out_shape=jax.ShapeDtypeStruct((B, S, D), x.dtype),
        grid_spec=pltpu.PrefetchScalarGridSpec(
            num_scalar_prefetch=0,
            grid=(n_tiles,),
            in_specs=[
                pl.BlockSpec((B, ts, D), lambda s: (0, s, 0)),   # whole batch per block
                pl.BlockSpec((ts, D), lambda s: (s, 0)),         # PE tile: one DMA per seq tile
            ],
            out_specs=pl.BlockSpec((B, ts, D), lambda s: (0, s, 0)),
        ),
        compiler_params=pltpu.CompilerParams(
            dimension_semantics=("parallel",),
            vmem_limit_bytes=vmem_limit,
        ),
        cost_estimate=cost,
    )(x, pe)


def _reference(x, pe):
    if pe.ndim == 3:
        pe = pe[0]
    S = x.shape[1]
    return (x + pe[None, :S, :].astype(x.dtype)).astype(x.dtype)


if __name__ == "__main__":
    key = jax.random.PRNGKey(0)
    k1, k2 = jax.random.split(key)

    # Path 1: exercises the Pallas kernel (lane-dense d_model, batch folded into the block).
    D_MODEL, MAX_SEQ = 128, 1024
    pe = create_sin_cos_encoding(D_MODEL, MAX_SEQ, dtype=jnp.float32)   # registered-buffer analogue
    x_big = jax.random.normal(k1, (2, 512, D_MODEL), dtype=jnp.float32)
    out_big = jax.block_until_ready(positional_encoding_forward(x_big, pe))
    np.testing.assert_allclose(np.asarray(out_big), np.asarray(_reference(x_big, pe)),
                               rtol=1e-6, atol=1e-6)

    # Path 2: tiny shape from the module spec example (batch=2, seq=8, d_model=32);
    # takes the fused-add fallback where pallas_call overhead would dominate.
    pe_small = create_sin_cos_encoding(32, 16, dtype=jnp.float32)
    x_small = jax.random.normal(k2, (2, 8, 32), dtype=jnp.float32)
    out_small = jax.block_until_ready(positional_encoding_forward(x_small, pe_small))
    np.testing.assert_allclose(np.asarray(out_small), np.asarray(_reference(x_small, pe_small)),
                               rtol=1e-6, atol=1e-6)

    print("KERNEL_OK")
</pallas_src>

<mosaic_0001>
module attributes {stable_mosaic.version = 11 : i64} {
  func.func @_pos_enc_kernel(%arg0: i32, %arg1: memref<2x256x128xf32, #tpu.memory_space<vmem>>, %arg2: memref<256x128xf32, #tpu.memory_space<vmem>>, %arg3: memref<2x256x128xf32, #tpu.memory_space<vmem>>) attributes {dimension_semantics = [#tpu.dimension_semantics<parallel>], iteration_bounds = array<i64: 2>, scalar_prefetch = 0 : i64, scratch_operands = 0 : i64, tpu.core_type = #tpu.core_type<tc>, window_params = [{transform_indices = @transform_0, window_bounds = array<i64: 2, 256, 128>}, {transform_indices = @transform_1, window_bounds = array<i64: 256, 128>}, {transform_indices = @transform_2, window_bounds = array<i64: 2, 256, 128>}]} {
    %c0 = arith.constant 0 : index
    %c0_0 = arith.constant 0 : index
    %0 = vector.load %arg2[%c0, %c0_0] : memref<256x128xf32, #tpu.memory_space<vmem>>, vector<256x128xf32>
    %c0_1 = arith.constant 0 : index
    %c0_2 = arith.constant 0 : index
    %c0_3 = arith.constant 0 : index
    %1 = vector.load %arg1[%c0_1, %c0_2, %c0_3] : memref<2x256x128xf32, #tpu.memory_space<vmem>>, vector<2x256x128xf32>
    %2 = vector.shape_cast %0 : vector<256x128xf32> to vector<1x256x128xf32>
    %3 = vector.broadcast %2 : vector<1x256x128xf32> to vector<2x256x128xf32>
    %4 = arith.addf %1, %3 : vector<2x256x128xf32>
    %c0_4 = arith.constant 0 : index
    %c0_5 = arith.constant 0 : index
    %c0_6 = arith.constant 0 : index
    %5 = vector.load %arg3[%c0_4, %c0_5, %c0_6] : memref<2x256x128xf32, #tpu.memory_space<vmem>>, vector<2x256x128xf32>
    tpu.vector_store %arg3[%c0_4, %c0_5, %c0_6], %4 {strides = array<i32>} : memref<2x256x128xf32, #tpu.memory_space<vmem>>, vector<2x256x128xf32>,
    return
  }
  func.func @transform_0(%arg0: i32) -> (i32, i32, i32) {
    %c0_i32 = arith.constant 0 : i32
    %c0_i32_0 = arith.constant 0 : i32
    %c0_i32_1 = arith.constant 0 : i32
    return %c0_i32, %arg0, %c0_i32_0 : i32, i32, i32
  }
  func.func @transform_1(%arg0: i32) -> (i32, i32) {
    %c0_i32 = arith.constant 0 : i32
    %c0_i32_0 = arith.constant 0 : i32
    return %arg0, %c0_i32 : i32, i32
  }
  func.func @transform_2(%arg0: i32) -> (i32, i32, i32) {
    %c0_i32 = arith.constant 0 : i32
    %c0_i32_0 = arith.constant 0 : i32
    %c0_i32_1 = arith.constant 0 : i32
    return %c0_i32, %arg0, %c0_i32_0 : i32, i32, i32
  }
}

</mosaic_0001>

<bundles_post_ra>
// kernel: tpu_custom_call.1
= control target key start
LH: loop header
LB: loop body
LE: loop exit
PB: predicated region body
PF: predicated region fallthrough
CT: control target
= control target key end

     0   :  { %7 = vsyncpa [#allocation3], 0  ;;  %s1241_s0 = inlined_call_operand.hbm [shape: f32[2,512,128], index: 0, kind: input, shape index: {}]   ;;  %s1242_s1 = inlined_call_operand.hbm [shape: f32[1024,128], index: 1, kind: input, shape index: {}]   ;;  %s1243_s2 = inlined_call_operand.hbm [shape: f32[2,512,128], index: 2, kind: output, shape index: {}]  }
   0x1   :  { %9 = vsyncpa [#allocation3 + $0x1], 0 }
   0x2   :  { %10 = vsyncpa [#allocation6], 0 }
   0x3   :  { %12 = vsyncpa [#allocation6 + $0x1], 0 }
   0x4   :  { %13 = vsyncpa [#allocation4], 0 }
   0x5   :  { %15 = vsyncpa [#allocation4 + $0x1], 0  ;;  %s789_s9 = smov 0   ;;  %s791_s10 = smov 0  }
   0x6   :  { %s793_s11 = smov 0   ;;  %s795_s12 = smov 0  }
   0x7 LB: > { %s810_s13 = sadd.s32 4294967295, %s757_s12   ;;  %s593_s14 = sadd.s32 4294967294, %s757_s12   ;;  %s757_s12 = sphi %s795_s12, %s1251_s12   ;;  %s753_s11 = sphi %s793_s11, %s1250_s11   ;;  %s749_s10 = sphi %s791_s10, %s1249_s10   ;;  %s745_s9 = sphi %s789_s9, %s1248_s9  }
   0x8   : > { %s814_s15 = sadd.s32 1, %s757_s12   ;;  %s28_s16 = sadd.s32 1, %s753_s11 }
   0x9   : > { %s25_s17 = ssub.s32 %s757_s12, %s814_s15  ;;  %p35_p0 = scmp.ne.s32.totalorder %s753_s11, %s749_s10 }
   0xa   : > { %p26_p1 = scmp.eq.s32.totalorder %s25_s17, 0  ;;  %p36_p2 = scmp.eq.s32.totalorder %s757_s12, 0 }
   0xb   : > { %p41_p3 = scmp.ne.s32.totalorder %s749_s10, %s745_s9  ;;  %p42_p4 = scmp.eq.s32.totalorder %s810_s13, 0 }
   0xc   : > { %s826_s18 = scalar_select %p26_p1, %s753_s11, %s28_s16  }
   0xd   : > { %p828_p5 = por %p36_p2, %p35_p0  ;;  %p832_p6 = por %p42_p4, %p41_p3 }
   0xe   : > { %p91_p7 = scmp.eq.s32.totalorder %s810_s13, 1  ;;  %p97_p8 = scmp.eq.s32.totalorder %s593_s14, 1 }
   0xf   : > { %p595_p11 = scmp.ge.s32.totalorder %s757_s12, 2 }
  0x10   : > { %p837_p9 = por %p91_p7, %p35_p0  ;;  %p841_p10 = por %p97_p8, %p41_p3 }
  0x11   : > { %113 = sbr.rel (%p595_p11) target bundleno = 51 (0x33), region = 16 }
  0x16   : > { %s849_s23 = sand.u32 1, %s753_s11   ;;  %s613_s24 = sshll.u32 %s757_s12, 8 }
  0x17   : > { %s596_s25 = sshll.u32 %s849_s23, 9  ;;  %s126_s28 = scalar_lea.hbm %s1241_s0, %s613_s24 }
  0x18   : > { %s616_s29 = scalar_select %p828_p5, [#allocation0], [#allocation12] }
  0x19   : > { %s139_s30 = sshll.u32 %s126_s28, 4  ;;  %s121_s3 = scalar_lea.vmem [#allocation2], %s596_s25  ;;  %s140_s30 = int_to_ptr.hbm [resolvable:$true] %s139_s30 }
  0x1a   : > { %s141_s4 = sshll.u32 %s121_s3, 4  ;;  %s131_s5 = sld [smem:[%s616_s29]]   ;;  %s142_s4 = int_to_ptr.vmem [resolvable:$true] %s141_s4 }
  0x1b   : > { %s759_s6 = smov 8192   ;;  %s760_s7 = smov 4096  }
  0x1c   : > { %617 = sst [smem:[#allocation9]] (%p828_p5), %s759_s6  ;;  %s761_s8 = smov 32  }
  0x1d   : > { %618 = sst [smem:[#allocation9 + $0x1]] (%p828_p5), %s760_s7  ;;  %s762_s14 = smov 128  }
  0x1e   : > { %619 = sst [smem:[#allocation9 + $0x2]] (%p828_p5), %s761_s8  ;;  %s763_s25 = smov 8  }
  0x1f   : > { %620 = sst [smem:[#allocation9 + $0x3]] (%p828_p5), %s762_s14  ;;  %s118_s26 = scalar_lea.sflag [#allocation3], %s849_s23 }
  0x20   : > { %s599_s16 = sshll.u32 %s131_s5, 26  ;;  %621 = sst [smem:[#allocation9 + $0x4]] (%p828_p5), %s762_s14 }
  0x21   : > { %s600_s17 = sadd.s32 134217728, %s599_s16  ;;  %622 = sst [smem:[#allocation9 + $0x5]] (%p828_p5), %s763_s25 }
  0x22   : > { %s764_s27 = smov [#allocation8]   ;;  %s601_s28 = sshll.u32 %s849_s23, 8 }
  0x23   : > { %623 = dma.general (%p828_p5), %s140_s30, 8192, %s142_s4, %s118_s26, %s764_s27, [#allocation9], %s600_s17, 0  }
  0x24   : > { %s173_s5 = scalar_lea.hbm %s1242_s1, %s613_s24  ;;  %s168_s7 = scalar_lea.vmem [#allocation5], %s601_s28 }
  0x25   : > { %s174_s6 = sshll.u32 %s173_s5, 4  ;;  %s176_s8 = sshll.u32 %s168_s7, 4  ;;  %s175_s6 = int_to_ptr.hbm [resolvable:$true] %s174_s6  ;;  %s177_s8 = int_to_ptr.vmem [resolvable:$true] %s176_s8 }
  0x26   : > { %s165_s14 = scalar_lea.sflag [#allocation6], %s849_s23  ;;  %s687_s16 = sshra.s32 %s175_s6, 4  ;;  %s688_s16 = int_to_ptr.hbm [resolvable:$true] %s687_s16 }
  0x27   : > { %s689_s25 = scalar_lea.hbm %s688_s16, 256  ;;  %s693_s17 = scalar_lea.hbm %s1242_s1, 1024 }
  0x28   : > { %p690_p12 = scmp.ne.s32.totalorder %s688_s16, %s689_s25  ;;  %p694_p1 = scmp.lt.s32.totalorder %s688_s16, %s1242_s1 }
  0x29   : > { %p695_p2 = scmp.lt.s32.totalorder %s693_s17, %s689_s25 }
  0x2a   : > { %p691_p13 = pnand %p690_p12, %p828_p5 }
  0x2b   : > { %p696_p3 = por %p695_p2, %p694_p1 }
  0x2c   : > { %p692_p0 = pneg %p691_p13 }
  0x2e   : > { %p697_p4 = pnand %p696_p3, %p692_p0 }
  0x30   : > { %700 = shalt.err (!%p697_p4)
}
  0x31   : > { %s765_s23 = smov 128   ;;  %s766_s24 = smov 8  }
  0x32   : > { %624 = dma.hbm_to_vmem [thread:$0]  (%p828_p5), %s175_s6, 4096, %s177_s8, %s165_s14, %s765_s23, %s765_s23, %s766_s24  }
  0x33 PF: > { %p604_p7 = scmp.ge.s32.totalorder %s757_s12, 1  ;;  %p184_p8 = scmp.lt.s32.totalorder %s757_s12, 3 }
  0x35   : > { %p185_p12 = pnand %p604_p7, %p184_p8 }
  0x36   : > { %s895_s28 = sand.u32 (!%p185_p12), 1, %s749_s10  }
  0x37   : > { %188 = sbr.rel (%p185_p12) target bundleno = 142 (0x8e), region = 28  ;;  %s605_s29 = sshll.u32 (!%p185_p12), %s895_s28, 9 }
  0x38   : > { %s191_s3 = scalar_lea.sflag (!%p185_p12), [#allocation3], %s895_s28  ;;  %s899_s5 = scalar_lea.vmem (!%p185_p12), [#allocation2], %s605_s29 }
  0x3c   : > { %732 = dma.done.wait (%p832_p6), %s191_s3, 8192  }
  0x3d   : > { %734 = vsyncadd (%p832_p6), %s191_s3, 4294959104  ;;  %s606_s19 = sshll.u32 %s895_s28, 8  ;;  %s201_s6 = scalar_lea.sflag [#allocation6], %s895_s28 }
  0x3e   : > { %s907_s7 = scalar_lea.vmem [#allocation5], %s606_s19 }
  0x3f   : > { %736 = dma.done.wait (%p832_p6), %s201_s6, 4096  }
  0x40   : > { %738 = vsyncadd (%p832_p6), %s201_s6, 4294963200  ;;  %v914_v0 = vld [vmem:[%s907_s7] sm:$0xff]  ;;  %v918_v2 = vld [vmem:[%s907_s7 + $0x8] sm:$0xff]  ;;  %s935_s20 = scalar_lea.vmem [#allocation7], %s605_s29  ;;  %s459_s8 = scalar_lea.sflag [#allocation4], %s895_s28 }
  0x41   : > { %v266_v1 = vld [vmem:[%s899_s5] sm:$0xff]  ;;  %v267_v4 = vld [vmem:[%s899_s5 + $0x8] sm:$0xff]  ;;  %v923_v5 = vld [vmem:[%s907_s7 + $0x10] sm:$0xff] }
  0x42   : > { %v330_v3 = vadd.f32 %v266_v1, %v914_v0  ;;  %v268_v6 = vld [vmem:[%s899_s5 + $0x10] sm:$0xff]  ;;  %v331_v7 = vadd.f32 %v267_v4, %v918_v2  ;;  %v929_v9 = vld [vmem:[%s907_s7 + $0x18] sm:$0xff]  ;;  %v933_v11 = vld [vmem:[%s907_s7 + $0x20] sm:$0xff] }
  0x43   : > { %v332_v8 = vadd.f32 %v268_v6, %v923_v5  ;;  %v269_v10 = vld [vmem:[%s899_s5 + $0x18] sm:$0xff]  ;;  %v270_v13 = vld [vmem:[%s899_s5 + $0x20] sm:$0xff]  ;;  %v941_v14 = vld [vmem:[%s907_s7 + $0x28] sm:$0xff] }
  0x44   : > { %394 = vst [vmem:[%s935_s20] sm:$0xff] %v330_v3  ;;  %v333_v12 = vadd.f32 %v269_v10, %v929_v9  ;;  %v271_v15 = vld [vmem:[%s899_s5 + $0x28] sm:$0xff]  ;;  %v334_v16 = vadd.f32 %v270_v13, %v933_v11  ;;  %v948_v18 = vld [vmem:[%s907_s7 + $0x30] sm:$0xff]  ;;  %v952_v20 = vld [vmem:[%s907_s7 + $0x38] sm:$0xff] }
  0x45   : > { %395 = vst [vmem:[%s935_s20 + $0x8] sm:$0xff] %v331_v7  ;;  %v335_v17 = vadd.f32 %v271_v15, %v941_v14  ;;  %v272_v19 = vld [vmem:[%s899_s5 + $0x30] sm:$0xff]  ;;  %v273_v22 = vld [vmem:[%s899_s5 + $0x38] sm:$0xff]  ;;  %v958_v23 = vld [vmem:[%s907_s7 + $0x40] sm:$0xff] }
  0x46   : > { %396 = vst [vmem:[%s935_s20 + $0x10] sm:$0xff] %v332_v8  ;;  %v336_v21 = vadd.f32 %v272_v19, %v948_v18  ;;  %v274_v24 = vld [vmem:[%s899_s5 + $0x40] sm:$0xff]  ;;  %v337_v25 = vadd.f32 %v273_v22, %v952_v20  ;;  %v964_v26 = vld [vmem:[%s907_s7 + $0x48] sm:$0xff]  ;;  %v968_v28 = vld [vmem:[%s907_s7 + $0x50] sm:$0xff] }
  0x47   : > { %397 = vst [vmem:[%s935_s20 + $0x18] sm:$0xff] %v333_v12  ;;  %v275_v27 = vld [vmem:[%s899_s5 + $0x48] sm:$0xff]  ;;  %v338_v29 = vadd.f32 %v274_v24, %v958_v23  ;;  %v276_v30 = vld [vmem:[%s899_s5 + $0x50] sm:$0xff]  ;;  %v974_v31 = vld [vmem:[%s907_s7 + $0x58] sm:$0xff] }
  0x48   : > { %398 = vst [vmem:[%s935_s20 + $0x20] sm:$0xff] %v334_v16  ;;  %v277_v32 = vld [vmem:[%s899_s5 + $0x58] sm:$0xff]  ;;  %v339_v33 = vadd.f32 %v275_v27, %v964_v26  ;;  %v980_v34 = vld [vmem:[%s907_s7 + $0x60] sm:$0xff]  ;;  %v340_v36 = vadd.f32 %v276_v30, %v968_v28  ;;  %v986_v37 = vld [vmem:[%s907_s7 + $0x68] sm:$0xff] }
  0x49   : > { %399 = vst [vmem:[%s935_s20 + $0x28] sm:$0xff] %v335_v17  ;;  %v278_v35 = vld [vmem:[%s899_s5 + $0x60] sm:$0xff]  ;;  %v279_v38 = vld [vmem:[%s899_s5 + $0x68] sm:$0xff]  ;;  %v341_v39 = vadd.f32 %v277_v32, %v974_v31  ;;  %v992_v40 = vld [vmem:[%s907_s7 + $0x70] sm:$0xff] }
  0x4a   : > { %400 = vst [vmem:[%s935_s20 + $0x30] sm:$0xff] %v336_v21  ;;  %v280_v41 = vld [vmem:[%s899_s5 + $0x70] sm:$0xff]  ;;  %v342_v42 = vadd.f32 %v278_v35, %v980_v34  ;;  %v998_v43 = vld [vmem:[%s907_s7 + $0x78] sm:$0xff]  ;;  %v343_v45 = vadd.f32 %v279_v38, %v986_v37  ;;  %v1004_v46 = vld [vmem:[%s907_s7 + $0x80] sm:$0xff] }
  0x4b   : > { %401 = vst [vmem:[%s935_s20 + $0x38] sm:$0xff] %v337_v25  ;;  %v281_v44 = vld [vmem:[%s899_s5 + $0x78] sm:$0xff]  ;;  %v282_v47 = vld [vmem:[%s899_s5 + $0x80] sm:$0xff]  ;;  %v344_v48 = vadd.f32 %v280_v41, %v992_v40  ;;  %v1010_v49 = vld [vmem:[%s907_s7 + $0x88] sm:$0xff] }
  0x4c   : > { %402 = vst [vmem:[%s935_s20 + $0x40] sm:$0xff] %v338_v29  ;;  %v283_v50 = vld [vmem:[%s899_s5 + $0x88] sm:$0xff]  ;;  %v345_v51 = vadd.f32 %v281_v44, %v998_v43  ;;  %v1016_v52 = vld [vmem:[%s907_s7 + $0x90] sm:$0xff]  ;;  %v346_v54 = vadd.f32 %v282_v47, %v1004_v46  ;;  %v1022_v55 = vld [vmem:[%s907_s7 + $0x98] sm:$0xff] }
  0x4d   : > { %403 = vst [vmem:[%s935_s20 + $0x48] sm:$0xff] %v339_v33  ;;  %v284_v53 = vld [vmem:[%s899_s5 + $0x90] sm:$0xff]  ;;  %v285_v56 = vld [vmem:[%s899_s5 + $0x98] sm:$0xff]  ;;  %v347_v57 = vadd.f32 %v283_v50, %v1010_v49  ;;  %v1028_v58 = vld [vmem:[%s907_s7 + $0xa0] sm:$0xff] }
  0x4e   : > { %404 = vst [vmem:[%s935_s20 + $0x50] sm:$0xff] %v340_v36  ;;  %v286_v59 = vld [vmem:[%s899_s5 + $0xa0] sm:$0xff]  ;;  %v348_v60 = vadd.f32 %v284_v53, %v1016_v52  ;;  %v1034_v61 = vld [vmem:[%s907_s7 + $0xa8] sm:$0xff]  ;;  %v349_v63 = vadd.f32 %v285_v56, %v1022_v55  ;;  %v1040_v1 = vld [vmem:[%s907_s7 + $0xb0] sm:$0xff] }
  0x4f   : > { %405 = vst [vmem:[%s935_s20 + $0x58] sm:$0xff] %v341_v39  ;;  %v287_v62 = vld [vmem:[%s899_s5 + $0xa8] sm:$0xff]  ;;  %v288_v3 = vld [vmem:[%s899_s5 + $0xb0] sm:$0xff]  ;;  %v350_v4 = vadd.f32 %v286_v59, %v1028_v58  ;;  %v1046_v6 = vld [vmem:[%s907_s7 + $0xb8] sm:$0xff] }
  0x50   : > { %406 = vst [vmem:[%s935_s20 + $0x60] sm:$0xff] %v342_v42  ;;  %v289_v7 = vld [vmem:[%s899_s5 + $0xb8] sm:$0xff]  ;;  %v351_v8 = vadd.f32 %v287_v62, %v1034_v61  ;;  %v1052_v10 = vld [vmem:[%s907_s7 + $0xc0] sm:$0xff]  ;;  %v352_v13 = vadd.f32 %v288_v3, %v1040_v1  ;;  %v1058_v15 = vld [vmem:[%s907_s7 + $0xc8] sm:$0xff] }
  0x51   : > { %407 = vst [vmem:[%s935_s20 + $0x68] sm:$0xff] %v343_v45  ;;  %v290_v12 = vld [vmem:[%s899_s5 + $0xc0] sm:$0xff]  ;;  %v291_v16 = vld [vmem:[%s899_s5 + $0xc8] sm:$0xff]  ;;  %v353_v17 = vadd.f32 %v289_v7, %v1046_v6  ;;  %v1064_v19 = vld [vmem:[%s907_s7 + $0xd0] sm:$0xff] }
  0x52   : > { %408 = vst [vmem:[%s935_s20 + $0x70] sm:$0xff] %v344_v48  ;;  %v292_v21 = vld [vmem:[%s899_s5 + $0xd0] sm:$0xff]  ;;  %v354_v22 = vadd.f32 %v290_v12, %v1052_v10  ;;  %v1070_v24 = vld [vmem:[%s907_s7 + $0xd8] sm:$0xff]  ;;  %v355_v27 = vadd.f32 %v291_v16, %v1058_v15  ;;  %v1076_v29 = vld [vmem:[%s907_s7 + $0xe0] sm:$0xff] }
  0x53   : > { %409 = vst [vmem:[%s935_s20 + $0x78] sm:$0xff] %v345_v51  ;;  %v293_v25 = vld [vmem:[%s899_s5 + $0xd8] sm:$0xff]  ;;  %v294_v30 = vld [vmem:[%s899_s5 + $0xe0] sm:$0xff]  ;;  %v356_v32 = vadd.f32 %v292_v21, %v1064_v19  ;;  %v1082_v33 = vld [vmem:[%s907_s7 + $0xe8] sm:$0xff] }
  0x54   : > { %410 = vst [vmem:[%s935_s20 + $0x80] sm:$0xff] %v346_v54  ;;  %v295_v35 = vld [vmem:[%s899_s5 + $0xe8] sm:$0xff]  ;;  %v357_v36 = vadd.f32 %v293_v25, %v1070_v24  ;;  %v1088_v38 = vld [vmem:[%s907_s7 + $0xf0] sm:$0xff]  ;;  %v358_v41 = vadd.f32 %v294_v30, %v1076_v29  ;;  %v1094_v42 = vld [vmem:[%s907_s7 + $0xf8] sm:$0xff] }
  0x55   : > { %411 = vst [vmem:[%s935_s20 + $0x88] sm:$0xff] %v347_v57  ;;  %v296_v39 = vld [vmem:[%s899_s5 + $0xf0] sm:$0xff]  ;;  %v297_v44 = vld [vmem:[%s899_s5 + $0xf8] sm:$0xff]  ;;  %v359_v45 = vadd.f32 %v295_v35, %v1082_v33  ;;  %v298_v47 = vld [vmem:[%s899_s5 + $0x100] sm:$0xff] }
  0x56   : > { %412 = vst [vmem:[%s935_s20 + $0x90] sm:$0xff] %v348_v60  ;;  %v360_v48 = vadd.f32 %v296_v39, %v1088_v38  ;;  %v299_v50 = vld [vmem:[%s899_s5 + $0x108] sm:$0xff]  ;;  %v361_v51 = vadd.f32 %v297_v44, %v1094_v42  ;;  %v300_v53 = vld [vmem:[%s899_s5 + $0x110] sm:$0xff]  ;;  %v362_v54 = vadd.f32 %v298_v47, %v914_v0  ;;  %v301_v56 = vld [vmem:[%s899_s5 + $0x118] sm:$0xff] }
  0x57   : > { %413 = vst [vmem:[%s935_s20 + $0x98] sm:$0xff] %v349_v63  ;;  %v363_v57 = vadd.f32 %v299_v50, %v918_v2  ;;  %v302_v59 = vld [vmem:[%s899_s5 + $0x120] sm:$0xff]  ;;  %v364_v60 = vadd.f32 %v300_v53, %v923_v5  ;;  %v303_v62 = vld [vmem:[%s899_s5 + $0x128] sm:$0xff]  ;;  %v365_v63 = vadd.f32 %v301_v56, %v929_v9  ;;  %v304_v0 = vld [vmem:[%s899_s5 + $0x130] sm:$0xff] }
  0x58   : > { %414 = vst [vmem:[%s935_s20 + $0xa0] sm:$0xff] %v350_v4  ;;  %v366_v3 = vadd.f32 %v302_v59, %v933_v11  ;;  %v305_v2 = vld [vmem:[%s899_s5 + $0x138] sm:$0xff]  ;;  %v367_v4 = vadd.f32 %v303_v62, %v941_v14  ;;  %v306_v5 = vld [vmem:[%s899_s5 + $0x140] sm:$0xff]  ;;  %v368_v7 = vadd.f32 %v304_v0, %v948_v18  ;;  %v307_v9 = vld [vmem:[%s899_s5 + $0x148] sm:$0xff] }
  0x59   : > { %415 = vst [vmem:[%s935_s20 + $0xa8] sm:$0xff] %v351_v8  ;;  %v369_v8 = vadd.f32 %v305_v2, %v952_v20  ;;  %v308_v11 = vld [vmem:[%s899_s5 + $0x150] sm:$0xff]  ;;  %v370_v12 = vadd.f32 %v306_v5, %v958_v23  ;;  %v309_v14 = vld [vmem:[%s899_s5 + $0x158] sm:$0xff]  ;;  %v310_v18 = vld [vmem:[%s899_s5 + $0x160] sm:$0xff] }
  0x5a   : > { %416 = vst [vmem:[%s935_s20 + $0xb0] sm:$0xff] %v352_v13  ;;  %v371_v13 = vadd.f32 %v307_v9, %v964_v26  ;;  %v372_v16 = vadd.f32 %v308_v11, %v968_v28  ;;  %v311_v20 = vld [vmem:[%s899_s5 + $0x168] sm:$0xff]  ;;  %v312_v23 = vld [vmem:[%s899_s5 + $0x170] sm:$0xff]  ;;  %v374_v21 = vadd.f32 %v310_v18, %v980_v34  ;;  %v313_v26 = vld [vmem:[%s899_s5 + $0x178] sm:$0xff] }
  0x5b   : > { %417 = vst [vmem:[%s935_s20 + $0xb8] sm:$0xff] %v353_v17  ;;  %v373_v17 = vadd.f32 %v309_v14, %v974_v31  ;;  %v314_v28 = vld [vmem:[%s899_s5 + $0x180] sm:$0xff]  ;;  %v376_v25 = vadd.f32 %v312_v23, %v992_v40  ;;  %v315_v31 = vld [vmem:[%s899_s5 + $0x188] sm:$0xff]  ;;  %v316_v34 = vld [vmem:[%s899_s5 + $0x190] sm:$0xff] }
  0x5c   : > { %418 = vst [vmem:[%s935_s20 + $0xc0] sm:$0xff] %v354_v22  ;;  %v375_v22 = vadd.f32 %v311_v20, %v986_v37  ;;  %v378_v30 = vadd.f32 %v314_v28, %v1004_v46  ;;  %v317_v37 = vld [vmem:[%s899_s5 + $0x198] sm:$0xff]  ;;  %v318_v40 = vld [vmem:[%s899_s5 + $0x1a0] sm:$0xff]  ;;  %v380_v35 = vadd.f32 %v316_v34, %v1016_v52  ;;  %v320_v46 = vld [vmem:[%s899_s5 + $0x1b0] sm:$0xff] }
  0x5d   : > { %419 = vst [vmem:[%s935_s20 + $0xc8] sm:$0xff] %v355_v27  ;;  %v377_v27 = vadd.f32 %v313_v26, %v998_v43  ;;  %v319_v43 = vld [vmem:[%s899_s5 + $0x1a8] sm:$0xff]  ;;  %v382_v39 = vadd.f32 %v318_v40, %v1028_v58  ;;  %v322_v52 = vld [vmem:[%s899_s5 + $0x1c0] sm:$0xff]  ;;  %v384_v44 = vadd.f32 %v320_v46, %v1040_v1  ;;  %v324_v58 = vld [vmem:[%s899_s5 + $0x1d0] sm:$0xff] }
  0x5e   : > { %420 = vst [vmem:[%s935_s20 + $0xd0] sm:$0xff] %v356_v32  ;;  %v379_v32 = vadd.f32 %v315_v31, %v1010_v49  ;;  %v321_v49 = vld [vmem:[%s899_s5 + $0x1b8] sm:$0xff]  ;;  %v386_v47 = vadd.f32 %v322_v52, %v1052_v10  ;;  %v326_v50 = vld [vmem:[%s899_s5 + $0x1e0] sm:$0xff]  ;;  %v388_v1 = vadd.f32 %v324_v58, %v1064_v19  ;;  %v328_v10 = vld [vmem:[%s899_s5 + $0x1f0] sm:$0xff] }
  0x5f   : > { %421 = vst [vmem:[%s935_s20 + $0xd8] sm:$0xff] %v357_v36  ;;  %v381_v36 = vadd.f32 %v317_v37, %v1022_v55  ;;  %v323_v55 = vld [vmem:[%s899_s5 + $0x1c8] sm:$0xff]  ;;  %v390_v53 = vadd.f32 %v326_v50, %v1076_v29  ;;  %v392_v56 = vadd.f32 %v328_v10, %v1088_v38 }
  0x60   : > { %422 = vst [vmem:[%s935_s20 + $0xe0] sm:$0xff] %v358_v41  ;;  %v383_v41 = vadd.f32 %v319_v43, %v1034_v61  ;;  %v325_v61 = vld [vmem:[%s899_s5 + $0x1d8] sm:$0xff] }
  0x61   : > { %423 = vst [vmem:[%s935_s20 + $0xe8] sm:$0xff] %v359_v45  ;;  %v385_v45 = vadd.f32 %v321_v49, %v1046_v6  ;;  %v327_v6 = vld [vmem:[%s899_s5 + $0x1e8] sm:$0xff] }
  0x62   : > { %424 = vst [vmem:[%s935_s20 + $0xf0] sm:$0xff] %v360_v48  ;;  %v387_v48 = vadd.f32 %v323_v55, %v1058_v15  ;;  %v391_v15 = vadd.f32 %v327_v6, %v1082_v33 }
  0x63   : > { %425 = vst [vmem:[%s935_s20 + $0xf8] sm:$0xff] %v361_v51  ;;  %v389_v51 = vadd.f32 %v325_v61, %v1070_v24 }
  0x64   : > { %426 = vst [vmem:[%s935_s20 + $0x100] sm:$0xff] %v362_v54  ;;  %v329_v54 = vld [vmem:[%s899_s5 + $0x1f8] sm:$0xff] }
  0x65   : > { %427 = vst [vmem:[%s935_s20 + $0x108] sm:$0xff] %v363_v57  ;;  %v393_v19 = vadd.f32 %v329_v54, %v1094_v42 }
  0x66   : > { %428 = vst [vmem:[%s935_s20 + $0x110] sm:$0xff] %v364_v60 }
  0x67   : > { %429 = vst [vmem:[%s935_s20 + $0x118] sm:$0xff] %v365_v63 }
  0x68   : > { %430 = vst [vmem:[%s935_s20 + $0x120] sm:$0xff] %v366_v3 }
  0x69   : > { %431 = vst [vmem:[%s935_s20 + $0x128] sm:$0xff] %v367_v4 }
  0x6a   : > { %432 = vst [vmem:[%s935_s20 + $0x130] sm:$0xff] %v368_v7 }
  0x6b   : > { %433 = vst [vmem:[%s935_s20 + $0x138] sm:$0xff] %v369_v8 }
  0x6c   : > { %434 = vst [vmem:[%s935_s20 + $0x140] sm:$0xff] %v370_v12 }
  0x6d   : > { %435 = vst [vmem:[%s935_s20 + $0x148] sm:$0xff] %v371_v13 }
  0x6e   : > { %436 = vst [vmem:[%s935_s20 + $0x150] sm:$0xff] %v372_v16 }
  0x6f   : > { %437 = vst [vmem:[%s935_s20 + $0x158] sm:$0xff] %v373_v17 }
  0x70   : > { %438 = vst [vmem:[%s935_s20 + $0x160] sm:$0xff] %v374_v21 }
  0x71   : > { %439 = vst [vmem:[%s935_s20 + $0x168] sm:$0xff] %v375_v22 }
  0x72   : > { %440 = vst [vmem:[%s935_s20 + $0x170] sm:$0xff] %v376_v25 }
  0x73   : > { %441 = vst [vmem:[%s935_s20 + $0x178] sm:$0xff] %v377_v27 }
  0x74   : > { %442 = vst [vmem:[%s935_s20 + $0x180] sm:$0xff] %v378_v30 }
  0x75   : > { %443 = vst [vmem:[%s935_s20 + $0x188] sm:$0xff] %v379_v32 }
  0x76   : > { %444 = vst [vmem:[%s935_s20 + $0x190] sm:$0xff] %v380_v35 }
  0x77   : > { %445 = vst [vmem:[%s935_s20 + $0x198] sm:$0xff] %v381_v36 }
  0x78   : > { %446 = vst [vmem:[%s935_s20 + $0x1a0] sm:$0xff] %v382_v39 }
  0x79   : > { %447 = vst [vmem:[%s935_s20 + $0x1a8] sm:$0xff] %v383_v41 }
  0x7a   : > { %448 = vst [vmem:[%s935_s20 + $0x1b0] sm:$0xff] %v384_v44 }
  0x7b   : > { %449 = vst [vmem:[%s935_s20 + $0x1b8] sm:$0xff] %v385_v45 }
  0x7c   : > { %450 = vst [vmem:[%s935_s20 + $0x1c0] sm:$0xff] %v386_v47 }
  0x7d   : > { %451 = vst [vmem:[%s935_s20 + $0x1c8] sm:$0xff] %v387_v48 }
  0x7e   : > { %452 = vst [vmem:[%s935_s20 + $0x1d0] sm:$0xff] %v388_v1 }
  0x7f   : > { %453 = vst [vmem:[%s935_s20 + $0x1d8] sm:$0xff] %v389_v51 }
  0x80   : > { %454 = vst [vmem:[%s935_s20 + $0x1e0] sm:$0xff] %v390_v53 }
  0x81   : > { %455 = vst [vmem:[%s935_s20 + $0x1e8] sm:$0xff] %v391_v15 }
  0x82   : > { %456 = vst [vmem:[%s935_s20 + $0x1f0] sm:$0xff] %v392_v56 }
  0x83   : > { %457 = vst [vmem:[%s935_s20 + $0x1f8] sm:$0xff] %v393_v19 }
  0x84   : > { %s615_s14 = sshll.u32 %s810_s13, 8  ;;  %s481_s16 = sshll.u32 %s935_s20, 4  ;;  %s482_s16 = int_to_ptr.vmem [resolvable:$true] %s481_s16 }
  0x85   : > { %s470_s4 = scalar_lea.hbm %s1243_s2, %s615_s14  ;;  %s767_s26 = smov 4096  }
  0x86   : > { %s483_s17 = sshll.u32 %s470_s4, 4  ;;  %627 = sst [smem:[#allocation11]] (%p837_p9), %s767_s26  ;;  %s484_s17 = int_to_ptr.hbm [resolvable:$true] %s483_s17 }
  0x87   : > { %s768_s27 = smov 8192   ;;  %s769_s23 = smov 32  }
  0x88   : > { %628 = sst [smem:[#allocation11 + $0x1]] (%p837_p9), %s768_s27  ;;  %s770_s13 = smov 128  }
  0x89   : > { %629 = sst [smem:[#allocation11 + $0x2]] (%p837_p9), %s769_s23  ;;  %s771_s24 = smov 8  }
  0x8a   : > { %630 = sst [smem:[#allocation11 + $0x3]] (%p837_p9), %s770_s13  ;;  %s772_s28 = smov [#allocation10]  }
  0x8b   : > { %631 = sst [smem:[#allocation11 + $0x4]] (%p837_p9), %s770_s13  ;;  %s773_s29 = smov 0  }
  0x8c   : > { %632 = sst [smem:[#allocation11 + $0x5]] (%p837_p9), %s771_s24 }
  0x8d   : > { %633 = dma.general (%p837_p9), %s482_s16, 8192, %s484_s17, %s459_s8, %s772_s28, [#allocation11], %s773_s29, 0  }
  0x8e PF: > { %s511_s3 = sand.u32 1, %s745_s9   ;;  %p636_p5 = pnand %p595_p11, %p841_p10 }
  0x8f   : > { %s512_s5 = scalar_lea.sflag [#allocation4], %s511_s3 }
  0x90   : > { %p637_p6 = pneg %p636_p5 }
  0x92   : > { %740 = dma.done.wait (%p637_p6), %s512_s5, 8192  }
  0x93   : > { %742 = vsyncadd (%p637_p6), %s512_s5, 4294959104  ;;  %p18_p13 = scmp.ge.s32.totalorder %s814_s15, 4   ;;  %s1248_s9 = smov %s749_s10 }
  0x94   : > { %s1249_s10 = smov %s753_s11  ;;  %s1250_s11 = smov %s826_s18 }
  0x95   : > { %s1251_s12 = smov %s814_s15  ;;  %20 = sbr.rel (!%p18_p13) target bundleno = 7 (0x7), region = 96 }
  0x9a   :  { %518 = vsyncpa [#allocation3], 1 }
  0x9b   :  { %520 = vsyncpa [#allocation3 + $0x1], 1 }
  0x9c   :  { %521 = vsyncpa [#allocation6], 1 }
  0x9d   :  { %523 = vsyncpa [#allocation6 + $0x1], 1 }
  0x9e   :  { %524 = vsyncpa [#allocation4], 1 }
  0x9f   :  { %526 = vsyncpa [#allocation4 + $0x1], 1 }

</bundles_post_ra>
